<compile_context>
chip_gen: v5e
topology: v5e:2x2
jax: 0.10.0
libtpu: 0.0.40
codegen_flags: <defaults>
</compile_context>

<pallas_src>
import functools

import jax
import jax.numpy as jnp
import numpy as np
from jax import lax
from jax.experimental import pallas as pl
from jax.experimental.pallas import tpu as pltpu


# ----------------------------------------------------------------------------
# Pallas kernel: full forward pass (GRU loop + MLP + fused heads + fuse)
# ----------------------------------------------------------------------------
def gru_mapping_kernel(
    x_ref,        # (T*Bp, D)    bf16  time-major GRU input, batch padded to Bp
    zrep_ref,     # (Bp, OD)     f32   repeat_interleave(z, num_data, dim=1), padded
    wih_ref,      # (D, 3H)      bf16  GRU weight_ih_l0 transposed (gate order r,z,n)
    whh_ref,      # (H, 3H)      f32   GRU weight_hh_l0 transposed (f32: serial path)
    bihf_ref,     # (1, 3H)      f32   bih with bhh[r,z] folded in
    bhhn_ref,     # (1, H)       f32   bhh n-gate slice (added inside r* term)
    w1_ref,       # (H, nh1)     bf16  MLP layer 1 (transposed)
    b1_ref,       # (1, nh1)     f32
    w2_ref,       # (nh1, nh2)   bf16  MLP layer 2 (transposed)
    b2_ref,       # (1, nh2)     f32
    wab_ref,      # (nh2, 2*OD)  bf16  fused [head_A | head_b] (transposed)
    bab_ref,      # (1, 2*OD)    f32
    out_ref,      # (Bp, OUTP)   f32   lane-dense slab [Z | y_A | y_b | pad]
    gi_scr,       # (T*Bp, 3H)   f32   scratch: hoisted input projection
):
    Bp, out_dim = zrep_ref.shape
    H = whh_ref.shape[0]
    T = x_ref.shape[0] // Bp

    # (1) Input projection for ALL timesteps at once: one MXU push instead of T.
    #     bih (+ folded bhh[r,z]) is added here with a single broadcast.
    gi_scr[...] = (
        jnp.dot(x_ref[...], wih_ref[...], preferred_element_type=jnp.float32)
        + bihf_ref[...]
    )

    # (2) Loop-invariant values hoisted out of the recurrence (JAX does not CSE
    #     broadcast_in_dim, so pre-broadcast the n-gate bias once).
    whh = whh_ref[...]
    bhh_n = jnp.broadcast_to(bhhn_ref[...], (Bp, H))

    def step(t, h):
        row = pl.multiple_of(t * Bp, Bp)
        gi = gi_scr[pl.ds(row, Bp), :]                     # (Bp, 3H) precomputed
        # Serial matmul kept in f32 (no per-step bf16 re-rounding of h).
        gh = jnp.dot(h, whh, preferred_element_type=jnp.float32)
        # PyTorch GRU gate order: reset, update, new.
        # One fused 2H-wide sigmoid push (EUP is single-issue & on the serial chain).
        rz = jax.nn.sigmoid(gi[:, 0:2 * H] + gh[:, 0:2 * H])
        r = rz[:, 0:H]
        zg = rz[:, H:2 * H]
        n = jnp.tanh(gi[:, 2 * H:3 * H] + r * (gh[:, 2 * H:3 * H] + bhh_n))
        return (1.0 - zg) * n + zg * h

    # (3) Short recurrence, unroll capped to bound vreg live ranges; h0 = 0.
    h_last = lax.fori_loop(
        0, T, step, jnp.zeros((Bp, H), jnp.float32), unroll=min(T, 8)
    )

    # (4) MLP (tanh after each affine layer), bf16 weights / f32 accumulation.
    m1 = jnp.tanh(
        jnp.dot(h_last.astype(jnp.bfloat16), w1_ref[...],
                preferred_element_type=jnp.float32) + b1_ref[...]
    )
    m2 = jnp.tanh(
        jnp.dot(m1.astype(jnp.bfloat16), w2_ref[...],
                preferred_element_type=jnp.float32) + b2_ref[...]
    )

    # (5) Fused heads: one matmul, split, fuse with z, single lane-dense store.
    y_ab = (
        jnp.dot(m2.astype(jnp.bfloat16), wab_ref[...],
                preferred_element_type=jnp.float32) + bab_ref[...]
    )
    y_a = y_ab[:, 0:out_dim]
    y_b = y_ab[:, out_dim:2 * out_dim]
    z_out = y_a * zrep_ref[...] + y_b

    parts = [z_out, y_a, y_b]
    lane_pad = out_ref.shape[1] - 3 * out_dim              # static
    if lane_pad:
        parts.append(jnp.zeros((Bp, lane_pad), jnp.float32))
    out_ref[...] = jnp.concatenate(parts, axis=1)


# ----------------------------------------------------------------------------
# One-time parameter prep (hoisted OFF the per-call path)
# ----------------------------------------------------------------------------
def prepare_params(params):
    """Pre-cast / pre-fuse constants once; returns kernel-ready param dict."""
    H = params["whh_t"].shape[0]
    bih_fold = params["bih"].at[:, 0:2 * H].add(params["bhh"][:, 0:2 * H])
    return {
        "wih": params["wih_t"].astype(jnp.bfloat16),
        "whh": params["whh_t"].astype(jnp.float32),        # f32: serial gh matmul
        "bih_fold": bih_fold.astype(jnp.float32),
        "bhh_n": params["bhh"][:, 2 * H:3 * H].astype(jnp.float32),
        "w1": params["w1_t"].astype(jnp.bfloat16),
        "b1": params["b1"].astype(jnp.float32),
        "w2": params["w2_t"].astype(jnp.bfloat16),
        "b2": params["b2"].astype(jnp.float32),
        "wab": jnp.concatenate([params["wa_t"], params["wb_t"]], axis=1
                               ).astype(jnp.bfloat16),
        "bab": jnp.concatenate([params["ba"], params["bb"]], axis=1
                               ).astype(jnp.float32),
    }


# ----------------------------------------------------------------------------
# Per-call wrapper (only x layout + z repeat + one pallas_call)
# ----------------------------------------------------------------------------
@functools.partial(jax.jit, static_argnames=("num_data",))
def gru_mapping_forward(x_btd, z, prepped, *, num_data):
    """x_btd: (B, T, input_dim) float32, z: (B, output_dim) float32."""
    B, T, D = x_btd.shape
    H = prepped["whh"].shape[0]
    out_dim = prepped["bab"].shape[1] // 2

    # Pad batch (sublane) dim to a multiple of 8 so vregs are fully occupied.
    Bp = ((B + 7) // 8) * 8
    # Pad output slab last dim to a multiple of 128 lanes (unmasked vst).
    out_pad = ((3 * out_dim + 127) // 128) * 128

    # Time-major layout, batch-padded, flattened to one 2-D matmul operand.
    x_tbd = jnp.transpose(x_btd, (1, 0, 2))                       # (T, B, D)
    x_tbd = jnp.pad(x_tbd, ((0, 0), (0, Bp - B), (0, 0)))
    x_flat = x_tbd.reshape(T * Bp, D).astype(jnp.bfloat16)

    # torch.repeat_interleave(z, num_data, dim=1) == jnp.repeat(z, num_data, axis=1)
    z_rep = jnp.pad(jnp.repeat(z, num_data, axis=1), ((0, Bp - B), (0, 0)))

    slab = pl.pallas_call(
        gru_mapping_kernel,
        out_shape=jax.ShapeDtypeStruct((Bp, out_pad), jnp.float32),
        in_specs=[pl.BlockSpec(memory_space=pltpu.MemorySpace.VMEM)] * 12,
        out_specs=pl.BlockSpec(memory_space=pltpu.MemorySpace.VMEM),
        scratch_shapes=[pltpu.VMEM((T * Bp, 3 * H), jnp.float32)],
    )(
        x_flat, z_rep,
        prepped["wih"], prepped["whh"], prepped["bih_fold"], prepped["bhh_n"],
        prepped["w1"], prepped["b1"], prepped["w2"], prepped["b2"],
        prepped["wab"], prepped["bab"],
    )

    Z = slab[:B, 0:out_dim]
    y_A = slab[:B, out_dim:2 * out_dim]
    y_b = slab[:B, 2 * out_dim:3 * out_dim]
    return Z, y_A, y_b


# ----------------------------------------------------------------------------
# Deterministic parameter init (matches module shapes; synthetic values)
# ----------------------------------------------------------------------------
def init_params(key, input_dim, output_dim, num_data, hidden_dim, nh_mlp):
    keys = jax.random.split(key, 12)
    s = 0.1
    H = hidden_dim
    nh1, nh2 = nh_mlp
    head_out = output_dim * num_data

    def nrm(k, shape):
        return (s * jax.random.normal(k, shape)).astype(jnp.float32)

    return {
        # GRU (PyTorch layout weight_ih_l0: (3H, D); stored transposed)
        "wih_t": nrm(keys[0], (input_dim, 3 * H)),
        "whh_t": nrm(keys[1], (H, 3 * H)),
        "bih": nrm(keys[2], (1, 3 * H)),
        "bhh": nrm(keys[3], (1, 3 * H)),
        # MLP(hidden_dim, nh_mlp) with tanh
        "w1_t": nrm(keys[4], (H, nh1)),
        "b1": nrm(keys[5], (1, nh1)),
        "w2_t": nrm(keys[6], (nh1, nh2)),
        "b2": nrm(keys[7], (1, nh2)),
        # heads
        "wa_t": nrm(keys[8], (nh2, head_out)),
        "ba": nrm(keys[9], (1, head_out)),
        "wb_t": nrm(keys[10], (nh2, head_out)),
        "bb": nrm(keys[11], (1, head_out)),
    }


# ----------------------------------------------------------------------------
# Pure-JAX f32 reference (mirrors the PyTorch forward exactly) for validation
# ----------------------------------------------------------------------------
def reference_forward(x_btd, z, params, *, num_data):
    B, T, D = x_btd.shape
    H = params["whh_t"].shape[0]
    h = jnp.zeros((B, H), jnp.float32)
    for t in range(T):
        x_t = x_btd[:, t, :]
        gi = x_t @ params["wih_t"] + params["bih"]
        gh = h @ params["whh_t"] + params["bhh"]
        r = jax.nn.sigmoid(gi[:, 0:H] + gh[:, 0:H])
        zg = jax.nn.sigmoid(gi[:, H:2 * H] + gh[:, H:2 * H])
        n = jnp.tanh(gi[:, 2 * H:3 * H] + r * gh[:, 2 * H:3 * H])
        h = (1.0 - zg) * n + zg * h
    m = jnp.tanh(h @ params["w1_t"] + params["b1"])
    m = jnp.tanh(m @ params["w2_t"] + params["b2"])
    y_a = m @ params["wa_t"] + params["ba"]
    y_b = m @ params["wb_t"] + params["bb"]
    z_rep = jnp.repeat(z, num_data, axis=1)
    return y_a * z_rep + y_b, y_a, y_b


if __name__ == "__main__":
    # Small shapes consistent with the module's forward
    B, T = 2, 8                    # batch, sequence length
    input_dim = 16
    hidden_dim = 32
    nh_mlp = (64, 32)
    output_dim = 8
    num_data = 4                   # head output = output_dim * num_data = 32

    key = jax.random.PRNGKey(0)
    k_param, k_x, k_z = jax.random.split(key, 3)

    params = init_params(k_param, input_dim, output_dim, num_data, hidden_dim, nh_mlp)
    prepped = prepare_params(params)           # constant prep: once, off hot path
    prepped = jax.block_until_ready(prepped)

    x = jax.random.normal(k_x, (B, T, input_dim), dtype=jnp.float32)
    # z drawn deterministically here (in the module z=None -> torch.randn)
    z = jax.random.normal(k_z, (B, output_dim), dtype=jnp.float32)

    Z, y_A, y_b = gru_mapping_forward(x, z, prepped, num_data=num_data)
    jax.block_until_ready((Z, y_A, y_b))

    # bf16 bulk-matmul weights with f32 accumulation -> relaxed tolerance vs f32 ref
    Z_ref, yA_ref, yb_ref = reference_forward(x, z, params, num_data=num_data)
    np.testing.assert_allclose(np.asarray(Z), np.asarray(Z_ref), rtol=2e-2, atol=2e-2)
    np.testing.assert_allclose(np.asarray(y_A), np.asarray(yA_ref), rtol=2e-2, atol=2e-2)
    np.testing.assert_allclose(np.asarray(y_b), np.asarray(yb_ref), rtol=2e-2, atol=2e-2)

    print("KERNEL_OK")
</pallas_src>

<mosaic_0001>
module attributes {stable_mosaic.version = 11 : i64} {
  func.func @gru_mapping_kernel(%arg0: memref<64x16xbf16, #tpu.memory_space<vmem>>, %arg1: memref<8x32xf32, #tpu.memory_space<vmem>>, %arg2: memref<16x96xbf16, #tpu.memory_space<vmem>>, %arg3: memref<32x96xf32, #tpu.memory_space<vmem>>, %arg4: memref<1x96xf32, #tpu.memory_space<vmem>>, %arg5: memref<1x32xf32, #tpu.memory_space<vmem>>, %arg6: memref<32x64xbf16, #tpu.memory_space<vmem>>, %arg7: memref<1x64xf32, #tpu.memory_space<vmem>>, %arg8: memref<64x32xbf16, #tpu.memory_space<vmem>>, %arg9: memref<1x32xf32, #tpu.memory_space<vmem>>, %arg10: memref<32x64xbf16, #tpu.memory_space<vmem>>, %arg11: memref<1x64xf32, #tpu.memory_space<vmem>>, %arg12: memref<8x128xf32, #tpu.memory_space<vmem>>, %arg13: memref<64x96xf32, #tpu.memory_space<vmem>>) attributes {dimension_semantics = [], scalar_prefetch = 0 : i64, scratch_operands = 1 : i64, tpu.core_type = #tpu.core_type<tc>} {
    %c0 = arith.constant 0 : index
    %c0_0 = arith.constant 0 : index
    %0 = vector.load %arg0[%c0, %c0_0] : memref<64x16xbf16, #tpu.memory_space<vmem>>, vector<64x16xbf16>
    %c0_1 = arith.constant 0 : index
    %c0_2 = arith.constant 0 : index
    %1 = vector.load %arg2[%c0_1, %c0_2] : memref<16x96xbf16, #tpu.memory_space<vmem>>, vector<16x96xbf16>
    %cst = arith.constant dense<0.000000e+00> : vector<64x96xf32>
    %2 = tpu.matmul %0, %1, %cst {dimension_numbers = #tpu.dot_dimension_numbers<[1], [0], [0], [1], [0, 0, 1, 1], [], []>} : vector<64x16xbf16>, vector<16x96xbf16>, vector<64x96xf32> -> vector<64x96xf32>
    %c0_3 = arith.constant 0 : index
    %c0_4 = arith.constant 0 : index
    %3 = vector.load %arg4[%c0_3, %c0_4] : memref<1x96xf32, #tpu.memory_space<vmem>>, vector<1x96xf32>
    %4 = vector.broadcast %3 : vector<1x96xf32> to vector<64x96xf32>
    %5 = arith.addf %2, %4 : vector<64x96xf32>
    %c0_5 = arith.constant 0 : index
    %c0_6 = arith.constant 0 : index
    %6 = vector.load %arg13[%c0_5, %c0_6] : memref<64x96xf32, #tpu.memory_space<vmem>>, vector<64x96xf32>
    tpu.vector_store %arg13[%c0_5, %c0_6], %5 {strides = array<i32>} : memref<64x96xf32, #tpu.memory_space<vmem>>, vector<64x96xf32>,
    %c0_7 = arith.constant 0 : index
    %c0_8 = arith.constant 0 : index
    %7 = vector.load %arg3[%c0_7, %c0_8] : memref<32x96xf32, #tpu.memory_space<vmem>>, vector<32x96xf32>
    %c0_9 = arith.constant 0 : index
    %c0_10 = arith.constant 0 : index
    %8 = vector.load %arg5[%c0_9, %c0_10] : memref<1x32xf32, #tpu.memory_space<vmem>>, vector<1x32xf32>
    %9 = vector.shape_cast %8 : vector<1x32xf32> to vector<1x32xf32>
    %10 = vector.broadcast %9 : vector<1x32xf32> to vector<8x32xf32>
    %cst_11 = arith.constant 0.000000e+00 : f32
    %11 = vector.broadcast %cst_11 : f32 to vector<8x32xf32>
    %c0_i32 = arith.constant 0 : i32
    %c8_i32 = arith.constant 8 : i32
    %12 = arith.muli %c0_i32, %c8_i32 : i32
    %13 = tpu.assume_multiple %12, 8 : i32
    %14 = arith.index_cast %13 : i32 to index
    %c0_12 = arith.constant 0 : index
    %15 = vector.load %arg13[%14, %c0_12] : memref<64x96xf32, #tpu.memory_space<vmem>>, vector<8x96xf32>
    %cst_13 = arith.constant dense<0.000000e+00> : vector<8x96xf32>
    %16 = tpu.matmul %11, %7, %cst_13 {dimension_numbers = #tpu.dot_dimension_numbers<[1], [0], [0], [1], [0, 0, 1, 1], [], []>} : vector<8x32xf32>, vector<32x96xf32>, vector<8x96xf32> -> vector<8x96xf32>
    %17 = vector.extract_strided_slice %15 {offsets = [0, 0], sizes = [8, 64], strides = [1, 1]} : vector<8x96xf32> to vector<8x64xf32>
    %18 = vector.extract_strided_slice %16 {offsets = [0, 0], sizes = [8, 64], strides = [1, 1]} : vector<8x96xf32> to vector<8x64xf32>
    %19 = arith.addf %17, %18 : vector<8x64xf32>
    %20 = arith.negf %19 : vector<8x64xf32>
    %21 = math.exp %20 : vector<8x64xf32>
    %cst_14 = arith.constant 1.000000e+00 : f32
    %22 = vector.broadcast %cst_14 : f32 to vector<8x64xf32>
    %23 = arith.addf %22, %21 : vector<8x64xf32>
    %24 = arith.divf %22, %23 : vector<8x64xf32>
    %25 = vector.extract_strided_slice %24 {offsets = [0, 0], sizes = [8, 32], strides = [1, 1]} : vector<8x64xf32> to vector<8x32xf32>
    %26 = vector.extract_strided_slice %24 {offsets = [0, 32], sizes = [8, 32], strides = [1, 1]} : vector<8x64xf32> to vector<8x32xf32>
    %27 = vector.extract_strided_slice %15 {offsets = [0, 64], sizes = [8, 32], strides = [1, 1]} : vector<8x96xf32> to vector<8x32xf32>
    %28 = vector.extract_strided_slice %16 {offsets = [0, 64], sizes = [8, 32], strides = [1, 1]} : vector<8x96xf32> to vector<8x32xf32>
    %29 = arith.addf %28, %10 : vector<8x32xf32>
    %30 = arith.mulf %25, %29 : vector<8x32xf32>
    %31 = arith.addf %27, %30 : vector<8x32xf32>
    %32 = math.tanh %31 : vector<8x32xf32>
    %cst_15 = arith.constant 1.000000e+00 : f32
    %33 = vector.broadcast %cst_15 : f32 to vector<8x32xf32>
    %34 = arith.subf %33, %26 : vector<8x32xf32>
    %35 = arith.mulf %34, %32 : vector<8x32xf32>
    %36 = arith.mulf %26, %11 : vector<8x32xf32>
    %37 = arith.addf %35, %36 : vector<8x32xf32>
    %c1_i32 = arith.constant 1 : i32
    %c8_i32_16 = arith.constant 8 : i32
    %38 = arith.muli %c1_i32, %c8_i32_16 : i32
    %39 = tpu.assume_multiple %38, 8 : i32
    %40 = arith.index_cast %39 : i32 to index
    %c0_17 = arith.constant 0 : index
    %41 = vector.load %arg13[%40, %c0_17] : memref<64x96xf32, #tpu.memory_space<vmem>>, vector<8x96xf32>
    %cst_18 = arith.constant dense<0.000000e+00> : vector<8x96xf32>
    %42 = tpu.matmul %37, %7, %cst_18 {dimension_numbers = #tpu.dot_dimension_numbers<[1], [0], [0], [1], [0, 0, 1, 1], [], []>} : vector<8x32xf32>, vector<32x96xf32>, vector<8x96xf32> -> vector<8x96xf32>
    %43 = vector.extract_strided_slice %41 {offsets = [0, 0], sizes = [8, 64], strides = [1, 1]} : vector<8x96xf32> to vector<8x64xf32>
    %44 = vector.extract_strided_slice %42 {offsets = [0, 0], sizes = [8, 64], strides = [1, 1]} : vector<8x96xf32> to vector<8x64xf32>
    %45 = arith.addf %43, %44 : vector<8x64xf32>
    %46 = arith.negf %45 : vector<8x64xf32>
    %47 = math.exp %46 : vector<8x64xf32>
    %cst_19 = arith.constant 1.000000e+00 : f32
    %48 = vector.broadcast %cst_19 : f32 to vector<8x64xf32>
    %49 = arith.addf %48, %47 : vector<8x64xf32>
    %50 = arith.divf %48, %49 : vector<8x64xf32>
    %51 = vector.extract_strided_slice %50 {offsets = [0, 0], sizes = [8, 32], strides = [1, 1]} : vector<8x64xf32> to vector<8x32xf32>
    %52 = vector.extract_strided_slice %50 {offsets = [0, 32], sizes = [8, 32], strides = [1, 1]} : vector<8x64xf32> to vector<8x32xf32>
    %53 = vector.extract_strided_slice %41 {offsets = [0, 64], sizes = [8, 32], strides = [1, 1]} : vector<8x96xf32> to vector<8x32xf32>
    %54 = vector.extract_strided_slice %42 {offsets = [0, 64], sizes = [8, 32], strides = [1, 1]} : vector<8x96xf32> to vector<8x32xf32>
    %55 = arith.addf %54, %10 : vector<8x32xf32>
    %56 = arith.mulf %51, %55 : vector<8x32xf32>
    %57 = arith.addf %53, %56 : vector<8x32xf32>
    %58 = math.tanh %57 : vector<8x32xf32>
    %cst_20 = arith.constant 1.000000e+00 : f32
    %59 = vector.broadcast %cst_20 : f32 to vector<8x32xf32>
    %60 = arith.subf %59, %52 : vector<8x32xf32>
    %61 = arith.mulf %60, %58 : vector<8x32xf32>
    %62 = arith.mulf %52, %37 : vector<8x32xf32>
    %63 = arith.addf %61, %62 : vector<8x32xf32>
    %c2_i32 = arith.constant 2 : i32
    %c8_i32_21 = arith.constant 8 : i32
    %64 = arith.muli %c2_i32, %c8_i32_21 : i32
    %65 = tpu.assume_multiple %64, 8 : i32
    %66 = arith.index_cast %65 : i32 to index
    %c0_22 = arith.constant 0 : index
    %67 = vector.load %arg13[%66, %c0_22] : memref<64x96xf32, #tpu.memory_space<vmem>>, vector<8x96xf32>
    %cst_23 = arith.constant dense<0.000000e+00> : vector<8x96xf32>
    %68 = tpu.matmul %63, %7, %cst_23 {dimension_numbers = #tpu.dot_dimension_numbers<[1], [0], [0], [1], [0, 0, 1, 1], [], []>} : vector<8x32xf32>, vector<32x96xf32>, vector<8x96xf32> -> vector<8x96xf32>
    %69 = vector.extract_strided_slice %67 {offsets = [0, 0], sizes = [8, 64], strides = [1, 1]} : vector<8x96xf32> to vector<8x64xf32>
    %70 = vector.extract_strided_slice %68 {offsets = [0, 0], sizes = [8, 64], strides = [1, 1]} : vector<8x96xf32> to vector<8x64xf32>
    %71 = arith.addf %69, %70 : vector<8x64xf32>
    %72 = arith.negf %71 : vector<8x64xf32>
    %73 = math.exp %72 : vector<8x64xf32>
    %cst_24 = arith.constant 1.000000e+00 : f32
    %74 = vector.broadcast %cst_24 : f32 to vector<8x64xf32>
    %75 = arith.addf %74, %73 : vector<8x64xf32>
    %76 = arith.divf %74, %75 : vector<8x64xf32>
    %77 = vector.extract_strided_slice %76 {offsets = [0, 0], sizes = [8, 32], strides = [1, 1]} : vector<8x64xf32> to vector<8x32xf32>
    %78 = vector.extract_strided_slice %76 {offsets = [0, 32], sizes = [8, 32], strides = [1, 1]} : vector<8x64xf32> to vector<8x32xf32>
    %79 = vector.extract_strided_slice %67 {offsets = [0, 64], sizes = [8, 32], strides = [1, 1]} : vector<8x96xf32> to vector<8x32xf32>
    %80 = vector.extract_strided_slice %68 {offsets = [0, 64], sizes = [8, 32], strides = [1, 1]} : vector<8x96xf32> to vector<8x32xf32>
    %81 = arith.addf %80, %10 : vector<8x32xf32>
    %82 = arith.mulf %77, %81 : vector<8x32xf32>
    %83 = arith.addf %79, %82 : vector<8x32xf32>
    %84 = math.tanh %83 : vector<8x32xf32>
    %cst_25 = arith.constant 1.000000e+00 : f32
    %85 = vector.broadcast %cst_25 : f32 to vector<8x32xf32>
    %86 = arith.subf %85, %78 : vector<8x32xf32>
    %87 = arith.mulf %86, %84 : vector<8x32xf32>
    %88 = arith.mulf %78, %63 : vector<8x32xf32>
    %89 = arith.addf %87, %88 : vector<8x32xf32>
    %c3_i32 = arith.constant 3 : i32
    %c8_i32_26 = arith.constant 8 : i32
    %90 = arith.muli %c3_i32, %c8_i32_26 : i32
    %91 = tpu.assume_multiple %90, 8 : i32
    %92 = arith.index_cast %91 : i32 to index
    %c0_27 = arith.constant 0 : index
    %93 = vector.load %arg13[%92, %c0_27] : memref<64x96xf32, #tpu.memory_space<vmem>>, vector<8x96xf32>
    %cst_28 = arith.constant dense<0.000000e+00> : vector<8x96xf32>
    %94 = tpu.matmul %89, %7, %cst_28 {dimension_numbers = #tpu.dot_dimension_numbers<[1], [0], [0], [1], [0, 0, 1, 1], [], []>} : vector<8x32xf32>, vector<32x96xf32>, vector<8x96xf32> -> vector<8x96xf32>
    %95 = vector.extract_strided_slice %93 {offsets = [0, 0], sizes = [8, 64], strides = [1, 1]} : vector<8x96xf32> to vector<8x64xf32>
    %96 = vector.extract_strided_slice %94 {offsets = [0, 0], sizes = [8, 64], strides = [1, 1]} : vector<8x96xf32> to vector<8x64xf32>
    %97 = arith.addf %95, %96 : vector<8x64xf32>
    %98 = arith.negf %97 : vector<8x64xf32>
    %99 = math.exp %98 : vector<8x64xf32>
    %cst_29 = arith.constant 1.000000e+00 : f32
    %100 = vector.broadcast %cst_29 : f32 to vector<8x64xf32>
    %101 = arith.addf %100, %99 : vector<8x64xf32>
    %102 = arith.divf %100, %101 : vector<8x64xf32>
    %103 = vector.extract_strided_slice %102 {offsets = [0, 0], sizes = [8, 32], strides = [1, 1]} : vector<8x64xf32> to vector<8x32xf32>
    %104 = vector.extract_strided_slice %102 {offsets = [0, 32], sizes = [8, 32], strides = [1, 1]} : vector<8x64xf32> to vector<8x32xf32>
    %105 = vector.extract_strided_slice %93 {offsets = [0, 64], sizes = [8, 32], strides = [1, 1]} : vector<8x96xf32> to vector<8x32xf32>
    %106 = vector.extract_strided_slice %94 {offsets = [0, 64], sizes = [8, 32], strides = [1, 1]} : vector<8x96xf32> to vector<8x32xf32>
    %107 = arith.addf %106, %10 : vector<8x32xf32>
    %108 = arith.mulf %103, %107 : vector<8x32xf32>
    %109 = arith.addf %105, %108 : vector<8x32xf32>
    %110 = math.tanh %109 : vector<8x32xf32>
    %cst_30 = arith.constant 1.000000e+00 : f32
    %111 = vector.broadcast %cst_30 : f32 to vector<8x32xf32>
    %112 = arith.subf %111, %104 : vector<8x32xf32>
    %113 = arith.mulf %112, %110 : vector<8x32xf32>
    %114 = arith.mulf %104, %89 : vector<8x32xf32>
    %115 = arith.addf %113, %114 : vector<8x32xf32>
    %c4_i32 = arith.constant 4 : i32
    %c8_i32_31 = arith.constant 8 : i32
    %116 = arith.muli %c4_i32, %c8_i32_31 : i32
    %117 = tpu.assume_multiple %116, 8 : i32
    %118 = arith.index_cast %117 : i32 to index
    %c0_32 = arith.constant 0 : index
    %119 = vector.load %arg13[%118, %c0_32] : memref<64x96xf32, #tpu.memory_space<vmem>>, vector<8x96xf32>
    %cst_33 = arith.constant dense<0.000000e+00> : vector<8x96xf32>
    %120 = tpu.matmul %115, %7, %cst_33 {dimension_numbers = #tpu.dot_dimension_numbers<[1], [0], [0], [1], [0, 0, 1, 1], [], []>} : vector<8x32xf32>, vector<32x96xf32>, vector<8x96xf32> -> vector<8x96xf32>
    %121 = vector.extract_strided_slice %119 {offsets = [0, 0], sizes = [8, 64], strides = [1, 1]} : vector<8x96xf32> to vector<8x64xf32>
    %122 = vector.extract_strided_slice %120 {offsets = [0, 0], sizes = [8, 64], strides = [1, 1]} : vector<8x96xf32> to vector<8x64xf32>
    %123 = arith.addf %121, %122 : vector<8x64xf32>
    %124 = arith.negf %123 : vector<8x64xf32>
    %125 = math.exp %124 : vector<8x64xf32>
    %cst_34 = arith.constant 1.000000e+00 : f32
    %126 = vector.broadcast %cst_34 : f32 to vector<8x64xf32>
    %127 = arith.addf %126, %125 : vector<8x64xf32>
    %128 = arith.divf %126, %127 : vector<8x64xf32>
    %129 = vector.extract_strided_slice %128 {offsets = [0, 0], sizes = [8, 32], strides = [1, 1]} : vector<8x64xf32> to vector<8x32xf32>
    %130 = vector.extract_strided_slice %128 {offsets = [0, 32], sizes = [8, 32], strides = [1, 1]} : vector<8x64xf32> to vector<8x32xf32>
    %131 = vector.extract_strided_slice %119 {offsets = [0, 64], sizes = [8, 32], strides = [1, 1]} : vector<8x96xf32> to vector<8x32xf32>
    %132 = vector.extract_strided_slice %120 {offsets = [0, 64], sizes = [8, 32], strides = [1, 1]} : vector<8x96xf32> to vector<8x32xf32>
    %133 = arith.addf %132, %10 : vector<8x32xf32>
    %134 = arith.mulf %129, %133 : vector<8x32xf32>
    %135 = arith.addf %131, %134 : vector<8x32xf32>
    %136 = math.tanh %135 : vector<8x32xf32>
    %cst_35 = arith.constant 1.000000e+00 : f32
    %137 = vector.broadcast %cst_35 : f32 to vector<8x32xf32>
    %138 = arith.subf %137, %130 : vector<8x32xf32>
    %139 = arith.mulf %138, %136 : vector<8x32xf32>
    %140 = arith.mulf %130, %115 : vector<8x32xf32>
    %141 = arith.addf %139, %140 : vector<8x32xf32>
    %c5_i32 = arith.constant 5 : i32
    %c8_i32_36 = arith.constant 8 : i32
    %142 = arith.muli %c5_i32, %c8_i32_36 : i32
    %143 = tpu.assume_multiple %142, 8 : i32
    %144 = arith.index_cast %143 : i32 to index
    %c0_37 = arith.constant 0 : index
    %145 = vector.load %arg13[%144, %c0_37] : memref<64x96xf32, #tpu.memory_space<vmem>>, vector<8x96xf32>
    %cst_38 = arith.constant dense<0.000000e+00> : vector<8x96xf32>
    %146 = tpu.matmul %141, %7, %cst_38 {dimension_numbers = #tpu.dot_dimension_numbers<[1], [0], [0], [1], [0, 0, 1, 1], [], []>} : vector<8x32xf32>, vector<32x96xf32>, vector<8x96xf32> -> vector<8x96xf32>
    %147 = vector.extract_strided_slice %145 {offsets = [0, 0], sizes = [8, 64], strides = [1, 1]} : vector<8x96xf32> to vector<8x64xf32>
    %148 = vector.extract_strided_slice %146 {offsets = [0, 0], sizes = [8, 64], strides = [1, 1]} : vector<8x96xf32> to vector<8x64xf32>
    %149 = arith.addf %147, %148 : vector<8x64xf32>
    %150 = arith.negf %149 : vector<8x64xf32>
    %151 = math.exp %150 : vector<8x64xf32>
    %cst_39 = arith.constant 1.000000e+00 : f32
    %152 = vector.broadcast %cst_39 : f32 to vector<8x64xf32>
    %153 = arith.addf %152, %151 : vector<8x64xf32>
    %154 = arith.divf %152, %153 : vector<8x64xf32>
    %155 = vector.extract_strided_slice %154 {offsets = [0, 0], sizes = [8, 32], strides = [1, 1]} : vector<8x64xf32> to vector<8x32xf32>
    %156 = vector.extract_strided_slice %154 {offsets = [0, 32], sizes = [8, 32], strides = [1, 1]} : vector<8x64xf32> to vector<8x32xf32>
    %157 = vector.extract_strided_slice %145 {offsets = [0, 64], sizes = [8, 32], strides = [1, 1]} : vector<8x96xf32> to vector<8x32xf32>
    %158 = vector.extract_strided_slice %146 {offsets = [0, 64], sizes = [8, 32], strides = [1, 1]} : vector<8x96xf32> to vector<8x32xf32>
    %159 = arith.addf %158, %10 : vector<8x32xf32>
    %160 = arith.mulf %155, %159 : vector<8x32xf32>
    %161 = arith.addf %157, %160 : vector<8x32xf32>
    %162 = math.tanh %161 : vector<8x32xf32>
    %cst_40 = arith.constant 1.000000e+00 : f32
    %163 = vector.broadcast %cst_40 : f32 to vector<8x32xf32>
    %164 = arith.subf %163, %156 : vector<8x32xf32>
    %165 = arith.mulf %164, %162 : vector<8x32xf32>
    %166 = arith.mulf %156, %141 : vector<8x32xf32>
    %167 = arith.addf %165, %166 : vector<8x32xf32>
    %c6_i32 = arith.constant 6 : i32
    %c8_i32_41 = arith.constant 8 : i32
    %168 = arith.muli %c6_i32, %c8_i32_41 : i32
    %169 = tpu.assume_multiple %168, 8 : i32
    %170 = arith.index_cast %169 : i32 to index
    %c0_42 = arith.constant 0 : index
    %171 = vector.load %arg13[%170, %c0_42] : memref<64x96xf32, #tpu.memory_space<vmem>>, vector<8x96xf32>
    %cst_43 = arith.constant dense<0.000000e+00> : vector<8x96xf32>
    %172 = tpu.matmul %167, %7, %cst_43 {dimension_numbers = #tpu.dot_dimension_numbers<[1], [0], [0], [1], [0, 0, 1, 1], [], []>} : vector<8x32xf32>, vector<32x96xf32>, vector<8x96xf32> -> vector<8x96xf32>
    %173 = vector.extract_strided_slice %171 {offsets = [0, 0], sizes = [8, 64], strides = [1, 1]} : vector<8x96xf32> to vector<8x64xf32>
    %174 = vector.extract_strided_slice %172 {offsets = [0, 0], sizes = [8, 64], strides = [1, 1]} : vector<8x96xf32> to vector<8x64xf32>
    %175 = arith.addf %173, %174 : vector<8x64xf32>
    %176 = arith.negf %175 : vector<8x64xf32>
    %177 = math.exp %176 : vector<8x64xf32>
    %cst_44 = arith.constant 1.000000e+00 : f32
    %178 = vector.broadcast %cst_44 : f32 to vector<8x64xf32>
    %179 = arith.addf %178, %177 : vector<8x64xf32>
    %180 = arith.divf %178, %179 : vector<8x64xf32>
    %181 = vector.extract_strided_slice %180 {offsets = [0, 0], sizes = [8, 32], strides = [1, 1]} : vector<8x64xf32> to vector<8x32xf32>
    %182 = vector.extract_strided_slice %180 {offsets = [0, 32], sizes = [8, 32], strides = [1, 1]} : vector<8x64xf32> to vector<8x32xf32>
    %183 = vector.extract_strided_slice %171 {offsets = [0, 64], sizes = [8, 32], strides = [1, 1]} : vector<8x96xf32> to vector<8x32xf32>
    %184 = vector.extract_strided_slice %172 {offsets = [0, 64], sizes = [8, 32], strides = [1, 1]} : vector<8x96xf32> to vector<8x32xf32>
    %185 = arith.addf %184, %10 : vector<8x32xf32>
    %186 = arith.mulf %181, %185 : vector<8x32xf32>
    %187 = arith.addf %183, %186 : vector<8x32xf32>
    %188 = math.tanh %187 : vector<8x32xf32>
    %cst_45 = arith.constant 1.000000e+00 : f32
    %189 = vector.broadcast %cst_45 : f32 to vector<8x32xf32>
    %190 = arith.subf %189, %182 : vector<8x32xf32>
    %191 = arith.mulf %190, %188 : vector<8x32xf32>
    %192 = arith.mulf %182, %167 : vector<8x32xf32>
    %193 = arith.addf %191, %192 : vector<8x32xf32>
    %c7_i32 = arith.constant 7 : i32
    %c8_i32_46 = arith.constant 8 : i32
    %194 = arith.muli %c7_i32, %c8_i32_46 : i32
    %195 = tpu.assume_multiple %194, 8 : i32
    %196 = arith.index_cast %195 : i32 to index
    %c0_47 = arith.constant 0 : index
    %197 = vector.load %arg13[%196, %c0_47] : memref<64x96xf32, #tpu.memory_space<vmem>>, vector<8x96xf32>
    %cst_48 = arith.constant dense<0.000000e+00> : vector<8x96xf32>
    %198 = tpu.matmul %193, %7, %cst_48 {dimension_numbers = #tpu.dot_dimension_numbers<[1], [0], [0], [1], [0, 0, 1, 1], [], []>} : vector<8x32xf32>, vector<32x96xf32>, vector<8x96xf32> -> vector<8x96xf32>
    %199 = vector.extract_strided_slice %197 {offsets = [0, 0], sizes = [8, 64], strides = [1, 1]} : vector<8x96xf32> to vector<8x64xf32>
    %200 = vector.extract_strided_slice %198 {offsets = [0, 0], sizes = [8, 64], strides = [1, 1]} : vector<8x96xf32> to vector<8x64xf32>
    %201 = arith.addf %199, %200 : vector<8x64xf32>
    %202 = arith.negf %201 : vector<8x64xf32>
    %203 = math.exp %202 : vector<8x64xf32>
    %cst_49 = arith.constant 1.000000e+00 : f32
    %204 = vector.broadcast %cst_49 : f32 to vector<8x64xf32>
    %205 = arith.addf %204, %203 : vector<8x64xf32>
    %206 = arith.divf %204, %205 : vector<8x64xf32>
    %207 = vector.extract_strided_slice %206 {offsets = [0, 0], sizes = [8, 32], strides = [1, 1]} : vector<8x64xf32> to vector<8x32xf32>
    %208 = vector.extract_strided_slice %206 {offsets = [0, 32], sizes = [8, 32], strides = [1, 1]} : vector<8x64xf32> to vector<8x32xf32>
    %209 = vector.extract_strided_slice %197 {offsets = [0, 64], sizes = [8, 32], strides = [1, 1]} : vector<8x96xf32> to vector<8x32xf32>
    %210 = vector.extract_strided_slice %198 {offsets = [0, 64], sizes = [8, 32], strides = [1, 1]} : vector<8x96xf32> to vector<8x32xf32>
    %211 = arith.addf %210, %10 : vector<8x32xf32>
    %212 = arith.mulf %207, %211 : vector<8x32xf32>
    %213 = arith.addf %209, %212 : vector<8x32xf32>
    %214 = math.tanh %213 : vector<8x32xf32>
    %cst_50 = arith.constant 1.000000e+00 : f32
    %215 = vector.broadcast %cst_50 : f32 to vector<8x32xf32>
    %216 = arith.subf %215, %208 : vector<8x32xf32>
    %217 = arith.mulf %216, %214 : vector<8x32xf32>
    %218 = arith.mulf %208, %193 : vector<8x32xf32>
    %219 = arith.addf %217, %218 : vector<8x32xf32>
    %c8_i32_51 = arith.constant 8 : i32
    %220 = arith.truncf %219 : vector<8x32xf32> to vector<8x32xbf16>
    %c0_52 = arith.constant 0 : index
    %c0_53 = arith.constant 0 : index
    %221 = vector.load %arg6[%c0_52, %c0_53] : memref<32x64xbf16, #tpu.memory_space<vmem>>, vector<32x64xbf16>
    %cst_54 = arith.constant dense<0.000000e+00> : vector<8x64xf32>
    %222 = tpu.matmul %220, %221, %cst_54 {dimension_numbers = #tpu.dot_dimension_numbers<[1], [0], [0], [1], [0, 0, 1, 1], [], []>} : vector<8x32xbf16>, vector<32x64xbf16>, vector<8x64xf32> -> vector<8x64xf32>
    %c0_55 = arith.constant 0 : index
    %c0_56 = arith.constant 0 : index
    %223 = vector.load %arg7[%c0_55, %c0_56] : memref<1x64xf32, #tpu.memory_space<vmem>>, vector<1x64xf32>
    %224 = vector.broadcast %223 : vector<1x64xf32> to vector<8x64xf32>
    %225 = arith.addf %222, %224 : vector<8x64xf32>
    %226 = math.tanh %225 : vector<8x64xf32>
    %227 = arith.truncf %226 : vector<8x64xf32> to vector<8x64xbf16>
    %c0_57 = arith.constant 0 : index
    %c0_58 = arith.constant 0 : index
    %228 = vector.load %arg8[%c0_57, %c0_58] : memref<64x32xbf16, #tpu.memory_space<vmem>>, vector<64x32xbf16>
    %cst_59 = arith.constant dense<0.000000e+00> : vector<8x32xf32>
    %229 = tpu.matmul %227, %228, %cst_59 {dimension_numbers = #tpu.dot_dimension_numbers<[1], [0], [0], [1], [0, 0, 1, 1], [], []>} : vector<8x64xbf16>, vector<64x32xbf16>, vector<8x32xf32> -> vector<8x32xf32>
    %c0_60 = arith.constant 0 : index
    %c0_61 = arith.constant 0 : index
    %230 = vector.load %arg9[%c0_60, %c0_61] : memref<1x32xf32, #tpu.memory_space<vmem>>, vector<1x32xf32>
    %231 = vector.broadcast %230 : vector<1x32xf32> to vector<8x32xf32>
    %232 = arith.addf %229, %231 : vector<8x32xf32>
    %233 = math.tanh %232 : vector<8x32xf32>
    %234 = arith.truncf %233 : vector<8x32xf32> to vector<8x32xbf16>
    %c0_62 = arith.constant 0 : index
    %c0_63 = arith.constant 0 : index
    %235 = vector.load %arg10[%c0_62, %c0_63] : memref<32x64xbf16, #tpu.memory_space<vmem>>, vector<32x64xbf16>
    %cst_64 = arith.constant dense<0.000000e+00> : vector<8x64xf32>
    %236 = tpu.matmul %234, %235, %cst_64 {dimension_numbers = #tpu.dot_dimension_numbers<[1], [0], [0], [1], [0, 0, 1, 1], [], []>} : vector<8x32xbf16>, vector<32x64xbf16>, vector<8x64xf32> -> vector<8x64xf32>
    %c0_65 = arith.constant 0 : index
    %c0_66 = arith.constant 0 : index
    %237 = vector.load %arg11[%c0_65, %c0_66] : memref<1x64xf32, #tpu.memory_space<vmem>>, vector<1x64xf32>
    %238 = vector.broadcast %237 : vector<1x64xf32> to vector<8x64xf32>
    %239 = arith.addf %236, %238 : vector<8x64xf32>
    %240 = vector.extract_strided_slice %239 {offsets = [0, 0], sizes = [8, 32], strides = [1, 1]} : vector<8x64xf32> to vector<8x32xf32>
    %241 = vector.extract_strided_slice %239 {offsets = [0, 32], sizes = [8, 32], strides = [1, 1]} : vector<8x64xf32> to vector<8x32xf32>
    %c0_67 = arith.constant 0 : index
    %c0_68 = arith.constant 0 : index
    %242 = vector.load %arg1[%c0_67, %c0_68] : memref<8x32xf32, #tpu.memory_space<vmem>>, vector<8x32xf32>
    %243 = arith.mulf %240, %242 : vector<8x32xf32>
    %244 = arith.addf %243, %241 : vector<8x32xf32>
    %cst_69 = arith.constant 0.000000e+00 : f32
    %245 = vector.broadcast %cst_69 : f32 to vector<8x32xf32>
    %246 = tpu.concatenate %244, %240, %241, %245 in 1 : vector<8x32xf32>, vector<8x32xf32>, vector<8x32xf32>, vector<8x32xf32> -> vector<8x128xf32>
    %c0_70 = arith.constant 0 : index
    %c0_71 = arith.constant 0 : index
    %247 = vector.load %arg12[%c0_70, %c0_71] : memref<8x128xf32, #tpu.memory_space<vmem>>, vector<8x128xf32>
    tpu.vector_store %arg12[%c0_70, %c0_71], %246 {strides = array<i32>} : memref<8x128xf32, #tpu.memory_space<vmem>>, vector<8x128xf32>,
    return
  }
}

</mosaic_0001>

<bundles_post_ra>
// kernel: gru_mapping_forward.1
= control target key start
LH: loop header
LB: loop body
LE: loop exit
PB: predicated region body
PF: predicated region fallthrough
CT: control target
= control target key end

     0   :  { %vm82_vm0 = vcmask 130048   ;;  %s977_s16 = smov 64   ;;  %v978_v7 = vmov 0.0   ;;  %vm124_vm1 = vcmask 785408   ;;  %vm141_vm6 = vcmask 261120   ;;  %s1237_s3 = inlined_call_operand.vmem [shape: f32[32,96], index: 3, kind: input, shape index: {}]   ;;  %s1238_s2 = inlined_call_operand.vmem [shape: bf16[16,96], index: 2, kind: input, shape index: {}]   ;;  %s1239_s0 = inlined_call_operand.vmem [shape: bf16[64,16], index: 0, kind: input, shape index: {}]   ;;  %s1240_s5 = inlined_call_operand.vmem [shape: f32[1,32], index: 5, kind: input, shape index: {}]   ;;  %s1241_s4 = inlined_call_operand.vmem [shape: f32[1,96], index: 4, kind: input, shape index: {}]   ;;  %s1242_s7 = inlined_call_operand.vmem [shape: f32[1,64], index: 7, kind: input, shape index: {}]   ;;  %s1243_s6 = inlined_call_operand.vmem [shape: bf16[32,64], index: 6, kind: input, shape index: {}]   ;;  %s1244_s8 = inlined_call_operand.vmem [shape: bf16[64,32], index: 8, kind: input, shape index: {}]   ;;  %s1245_s9 = inlined_call_operand.vmem [shape: f32[1,32], index: 9, kind: input, shape index: {}]   ;;  %s1246_s11 = inlined_call_operand.vmem [shape: f32[1,64], index: 11, kind: input, shape index: {}]   ;;  %s1247_s10 = inlined_call_operand.vmem [shape: bf16[32,64], index: 10, kind: input, shape index: {}]   ;;  %s1248_s1 = inlined_call_operand.vmem [shape: f32[8,32], index: 1, kind: input, shape index: {}]   ;;  %s1249_s12 = inlined_call_operand.vmem [shape: f32[8,128], index: 12, kind: output, shape index: {}]  }
   0x1   :  { %v1049_v0 = vld [vmem:[%s1237_s3 + $0x18] sm:$0xff]  ;;  %v906_v1 = vld [vmem:[%s1238_s2] sm:$0xff]  ;;  %v1057_v2 = vld [vmem:[%s1237_s3 + $0x10] sm:$0xff] }
   0x2   :  { %157 = vmatpush.msra.mxu1 %v1049_v0  ;;  %v1063_v3 = vld [vmem:[%s1237_s3 + $0x8] sm:$0xff]  ;;  %v902_v4 = vld [vmem:[%s1239_s0] sm:$0xff]  ;;  %227 = vmatpush.msra.mxu2 %v1049_v0 }
   0x3   :  { %102 = vmatpush.bf16.msra.mxu0 %v906_v1  ;;  %v920_v5 = vld [vmem:[%s1240_s5] ss:$0 sm:$0xff]  ;;  %915 = vmatpush.bf16.msra.mxu3 %v906_v1  ;;  %v905_v1 = vld [vmem:[%s1239_s0 + $0x18] sm:$0xff] }
   0x4   :  { %158 = vmatpush.msra.mxu1 %v1057_v2  ;;  %228 = vmatpush.msra.mxu2 %v1057_v2  ;;  %v1077_v6 = vld [vmem:[%s1237_s3] sm:$0xff] }
   0x5   :  { %185 = vrot.lane.b32.xlu0 %v920_v5, %s977_s16  ;;  %v1104_v8 = vld [vmem:[%s1241_s4] ss:$0 sm:$0xff]  ;;  %s979_s4 = smov 96  }
   0x6   :  { %159 = vmatpush.msra.mxu1 %v1063_v3  ;;  %848 = vmatmul.msk.bf16.vlgmr.msra.gmra.mxu0 %vm82_vm0, %v902_v4  ;;  %v903_v4 = vld [vmem:[%s1239_s0 + $0x8] sm:$0xff] }
   0x7   :  { %294 = vmatpush.msrb.mxu3 %v1049_v0  ;;  %229 = vmatpush.msra.mxu2 %v1063_v3 }
   0x8   :  { %160 = vmatpush.msra.mxu1 %v1077_v6  ;;  %851 = vmatmul.msk.bf16.vlgmr.msra.gmra.mxu3 %vm82_vm0, %v905_v1 }
   0x9   :  { %295 = vmatpush.msrb.mxu3 %v1057_v2  ;;  %161 = vmatmul.f32.vlgmr.msra.gmra.mxu1 %v978_v7 }
   0xa   :  { %230 = vmatpush.msra.mxu2 %v1077_v6  ;;  %361 = vmatpush.msrb.mxu1 %v1049_v0 }
   0xb   :  { %296 = vmatpush.msrb.mxu3 %v1063_v3 }
   0xc   :  { %428 = vmatpush.msrb.mxu2 %v1049_v0  ;;  %362 = vmatpush.msrb.mxu1 %v1057_v2 }
   0xd   :  { %297 = vmatpush.msrb.mxu3 %v1077_v6 }
   0xe   :  { %429 = vmatpush.msrb.mxu2 %v1057_v2  ;;  %363 = vmatpush.msrb.mxu1 %v1063_v3 }
   0xf   :  { %495 = vmatpush.msra.mxu3 %v1049_v0 }
  0x10   :  { %430 = vmatpush.msrb.mxu2 %v1063_v3  ;;  %364 = vmatpush.msrb.mxu1 %v1077_v6 }
  0x11   :  { %496 = vmatpush.msra.mxu3 %v1057_v2 }
  0x12   :  { %431 = vmatpush.msrb.mxu2 %v1077_v6  ;;  %562 = vmatpush.msra.mxu1 %v1049_v0 }
  0x13   :  { %497 = vmatpush.msra.mxu3 %v1063_v3 }
  0x14   :  { %563 = vmatpush.msra.mxu1 %v1057_v2 }
  0x15   :  { %498 = vmatpush.msra.mxu3 %v1077_v6 }
  0x16   :  { %564 = vmatpush.msra.mxu1 %v1063_v3  ;;  %849 = vmatmul.msk.bf16.gmra.mxu0 %vm82_vm0, %v903_v4 }
  0x18   :  { %565 = vmatpush.msra.mxu1 %v1077_v6 }
  0x77   :  { %v1107_v11 = vpop.permute.xlu0 %185 }
  0x83   :  { %v104_v9 = vpop.f32.mrf.mxu0 }
  0x84   :  { %v105_v10 = vadd.f32 %v1104_v8, %v104_v9 }
  0x86   :  { %125 = vst.msk [vmem:[#allocation2] sm:$0xff] %vm124_vm1, %v105_v10  ;;  %v162_v12 = vpop.f32.mrf.mxu1 }
  0x87   :  { %v188_v13 = vadd.f32 %v1107_v11, %v162_v12 }
  0x89   :  { %190 = vrot.lane.b32.xlu0 %v188_v13, %s977_s16 }
  0x8b   :  { %v106_v14 = vpop.f32.mrf.mxu0 }
  0x8c   :  { %v107_v15 = vadd.f32 %v1104_v8, %v106_v14 }
  0x8d   :  { %v140_v16 = vld [vmem:[#allocation2] sm:$0xff] }
  0x8e   :  { %126 = vst.msk [vmem:[#allocation2 + $0x8] sm:$0xff] %vm124_vm1, %v107_v15  ;;  %v165_v17 = vadd.f32 %v162_v12, %v140_v16 }
  0x90   :  { %v852_v18 = vmul.f32 -1.442695, %v165_v17 }
  0x92   :  { %925 = vpow2.f32 %v852_v18 }
  0x93   :  { %v109_v14 = vpop.f32.mrf.mxu0 }
  0x94   :  { %v110_v15 = vadd.f32 %v1104_v8, %v109_v14 }
  0x95   :  { %v209_v44 = vld [vmem:[#allocation2 + $0x8] sm:$0xff] }
  0x96   :  { %127 = vst.msk [vmem:[#allocation2 + $0x10] sm:$0xff] %vm124_vm1, %v110_v15 }
  0x98   :  { %v926_v19 = vpop.eup %925 }
  0x99   :  { %v169_v20 = vadd.f32 1.0, %v926_v19 }
  0x9b   :  { %927 = vrcp.f32 %v169_v20  ;;  %v181_v26 = vand.u32 2147483648, %v169_v20  ;;  %vm175_vm3 = vweird.f32 %v169_v20  ;;  %v179_v27 = vand.u32 2147483647, %v169_v20 }
  0x9d   :  { %v182_v29 = vor.u32 1.1754944e-38, %v181_v26  ;;  %vm180_vm5 = vcmp.eq.f32.partialorder %v179_v27, 8.507059e+37 }
  0xa1   :  { %v928_v21 = vpop.eup %927 }
  0xa2   :  { %v171_v22 = vmul.f32 %v928_v21, %v169_v20  ;;  %vm176_vm2 = vweird.f32 %v928_v21  ;;  %v276_v20 = vld [vmem:[#allocation2 + $0x10] sm:$0xff] }
  0xa3   :  { %vm177_vm4 = vmor %vm175_vm3, %vm176_vm2 }
  0xa4   :  { %v172_v23 = vsub.f32 1.0, %v171_v22 }
  0xa6   :  { %v173_v24 = vmul.f32 %v928_v21, %v172_v23 }
  0xa8   :  { %v174_v25 = vadd.f32 %v928_v21, %v173_v24 }
  0xaa   :  { %v178_v28 = vsel %vm177_vm4, %v928_v21, %v174_v25 }
  0xab   :  { %v183_v31 = vsel %vm180_vm5, %v182_v29, %v178_v28 }
  0xac   :  { %v200_v36 = vsub.f32 1.0, %v183_v31  ;;  %v206_v39 = vmul.f32 0.0, %v183_v31 }
  0xfb   :  { %v191_v30 = vpop.permute.xlu0 %190 }
  0xfc   :  { %v193_v32 = vmul.f32 %v191_v30, %v183_v31 }
  0xfe   :  { %195 = vrot.lane.b32.xlu1 %v193_v32, %s977_s16 }
 0x170   :  { %v196_v33 = vpop.permute.xlu1 %195 }
 0x171   :  { %v198_v34 = vadd.f32 %v196_v33, %v140_v16  ;;  %v111_v16 = vpop.f32.mrf.mxu0 }
 0x172   :  { %v112_v17 = vadd.f32 %v1104_v8, %v111_v16 }
 0x173   :  { %929 = vtanh.f32 %v198_v34 }
 0x174   :  { %128 = vst.msk [vmem:[#allocation2 + $0x18] sm:$0xff] %vm124_vm1, %v112_v17 }
 0x179   :  { %v930_v35 = vpop.eup %929 }
 0x17a   :  { %202 = vrot.lane.b32.xlu1 %v930_v35, %s979_s4 }
 0x1ec   :  { %v203_v37 = vpop.permute.xlu1 %202 }
 0x1ed   :  { %v205_v38 = vmul.f32 %v203_v37, %v200_v36 }
 0x1ef   :  { %v207_v40 = vadd.f32 %v206_v39, %v205_v38 }
 0x1f1   :  { %211 = vrot.lane.b32.xlu2 %v207_v40, %s979_s4 }
 0x24b   :  { %v212_v41 = vpop.permute.xlu2 %211 }
 0x24c   :  { %853 = vmatmul.msk.f32.vlgmr.msra.gmra.mxu2 %vm141_vm6, %v212_v41 }
 0x24d   :  { %629 = vmatpush.msra.mxu2 %v1049_v0  ;;  %v119_v0 = vpop.f32.mrf.mxu3 }
 0x24f   :  { %630 = vmatpush.msra.mxu2 %v1057_v2  ;;  %v120_v2 = vadd.f32 %v1104_v8, %v119_v0 }
 0x251   :  { %631 = vmatpush.msra.mxu2 %v1063_v3  ;;  %131 = vst.msk [vmem:[#allocation2 + $0x30] sm:$0xff] %vm124_vm1, %v120_v2 }
 0x253   :  { %632 = vmatpush.msra.mxu2 %v1077_v6 }
 0x255   :  { %v121_v3 = vpop.f32.mrf.mxu3 }
 0x256   :  { %v122_v6 = vadd.f32 %v1104_v8, %v121_v3 }
 0x258   :  { %132 = vst.msk [vmem:[#allocation2 + $0x38] sm:$0xff] %vm124_vm1, %v122_v6 }
 0x2cf   :  { %v232_v42 = vpop.f32.mrf.mxu2 }
 0x2d0   :  { %v255_v43 = vadd.f32 %v232_v42, %v1107_v11  ;;  %v235_v45 = vadd.f32 %v232_v42, %v209_v44 }
 0x2d2   :  { %257 = vrot.lane.b32.xlu2 %v255_v43, %s977_s16  ;;  %v854_v46 = vmul.f32 -1.442695, %v235_v45 }
 0x2d4   :  { %931 = vpow2.f32 %v854_v46 }
 0x2da   :  { %v932_v47 = vpop.eup %931 }
 0x2db   :  { %v239_v48 = vadd.f32 1.0, %v932_v47 }
 0x2dd   :  { %933 = vrcp.f32 %v239_v48  ;;  %v251_v54 = vand.u32 2147483648, %v239_v48  ;;  %vm245_vm8 = vweird.f32 %v239_v48  ;;  %v249_v55 = vand.u32 2147483647, %v239_v48 }
 0x2df   :  { %v252_v57 = vor.u32 1.1754944e-38, %v251_v54  ;;  %vm250_vm10 = vcmp.eq.f32.partialorder %v249_v55, 8.507059e+37 }
 0x2e3   :  { %v934_v49 = vpop.eup %933 }
 0x2e4   :  { %v241_v50 = vmul.f32 %v934_v49, %v239_v48  ;;  %vm246_vm7 = vweird.f32 %v934_v49  ;;  %v343_v48 = vld [vmem:[#allocation2 + $0x18] sm:$0xff] }
 0x2e5   :  { %vm247_vm9 = vmor %vm245_vm8, %vm246_vm7 }
 0x2e6   :  { %v242_v51 = vsub.f32 1.0, %v241_v50 }
 0x2e8   :  { %v243_v52 = vmul.f32 %v934_v49, %v242_v51 }
 0x2ea   :  { %v244_v53 = vadd.f32 %v934_v49, %v243_v52 }
 0x2ec   :  { %v248_v56 = vsel %vm247_vm9, %v934_v49, %v244_v53 }
 0x2ed   :  { %v253_v59 = vsel %vm250_vm10, %v252_v57, %v248_v56 }
 0x2ee   :  { %v267_v5 = vsub.f32 1.0, %v253_v59  ;;  %v273_v9 = vmul.f32 %v253_v59, %v207_v40 }
 0x32c   :  { %v258_v58 = vpop.permute.xlu2 %257 }
 0x32d   :  { %v260_v60 = vmul.f32 %v258_v58, %v253_v59 }
 0x32f   :  { %262 = vrot.lane.b32.xlu0 %v260_v60, %s977_s16 }
 0x3a1   :  { %v263_v61 = vpop.permute.xlu0 %262 }
 0x3a2   :  { %v265_v62 = vadd.f32 %v263_v61, %v209_v44 }
 0x3a4   :  { %935 = vtanh.f32 %v265_v62 }
 0x3aa   :  { %v936_v63 = vpop.eup %935 }
 0x3ab   :  { %269 = vrot.lane.b32.xlu1 %v936_v63, %s979_s4 }
 0x41d   :  { %v270_v7 = vpop.permute.xlu1 %269 }
 0x41e   :  { %v272_v10 = vmul.f32 %v270_v7, %v267_v5 }
 0x420   :  { %v274_v12 = vadd.f32 %v273_v9, %v272_v10  ;;  %v904_v9 = vld [vmem:[%s1239_s0 + $0x10] sm:$0xff] }
 0x421   :  { %850 = vmatmul.msk.bf16.gmra.mxu0 %vm82_vm0, %v904_v9 }
 0x422   :  { %278 = vrot.lane.b32.xlu2 %v274_v12, %s979_s4 }
 0x47c   :  { %v279_v13 = vpop.permute.xlu2 %278 }
 0x47d   :  { %855 = vmatmul.msk.f32.vlgmr.msrb.gmra.mxu3 %vm141_vm6, %v279_v13 }
 0x49e   :  { %v114_v0 = vpop.f32.mrf.mxu0 }
 0x49f   :  { %v115_v2 = vadd.f32 %v1104_v8, %v114_v0  ;;  %v544_v0 = vld [vmem:[#allocation2 + $0x30] sm:$0xff] }
 0x4a1   :  { %129 = vst.msk [vmem:[#allocation2 + $0x20] sm:$0xff] %vm124_vm1, %v115_v2 }
 0x4a6   :  { %v116_v6 = vpop.f32.mrf.mxu0 }
 0x4a7   :  { %v117_v16 = vadd.f32 %v1104_v8, %v116_v6 }
 0x4a9   :  { %130 = vst.msk [vmem:[#allocation2 + $0x28] sm:$0xff] %vm124_vm1, %v117_v16 }
 0x500   :  { %v299_v18 = vpop.f32.mrf.mxu3 }
 0x501   :  { %v322_v19 = vadd.f32 %v299_v18, %v1107_v11  ;;  %v302_v21 = vadd.f32 %v299_v18, %v276_v20 }
 0x503   :  { %324 = vrot.lane.b32.xlu0 %v322_v19, %s977_s16  ;;  %v856_v22 = vmul.f32 -1.442695, %v302_v21  ;;  %v410_v19 = vld [vmem:[#allocation2 + $0x20] sm:$0xff] }
 0x505   :  { %937 = vpow2.f32 %v856_v22 }
 0x50b   :  { %v938_v23 = vpop.eup %937 }
 0x50c   :  { %v306_v24 = vadd.f32 1.0, %v938_v23 }
 0x50e   :  { %939 = vrcp.f32 %v306_v24  ;;  %v318_v30 = vand.u32 2147483648, %v306_v24  ;;  %vm312_vm12 = vweird.f32 %v306_v24  ;;  %v316_v31 = vand.u32 2147483647, %v306_v24 }
 0x510   :  { %v319_v33 = vor.u32 1.1754944e-38, %v318_v30  ;;  %vm317_vm14 = vcmp.eq.f32.partialorder %v316_v31, 8.507059e+37 }
 0x514   :  { %v940_v25 = vpop.eup %939 }
 0x515   :  { %v308_v26 = vmul.f32 %v940_v25, %v306_v24  ;;  %vm313_vm11 = vweird.f32 %v940_v25 }
 0x516   :  { %vm314_vm13 = vmor %vm312_vm12, %vm313_vm11 }
 0x517   :  { %v309_v27 = vsub.f32 1.0, %v308_v26 }
 0x519   :  { %v310_v28 = vmul.f32 %v940_v25, %v309_v27 }
 0x51b   :  { %v311_v29 = vadd.f32 %v940_v25, %v310_v28 }
 0x51d   :  { %v315_v32 = vsel %vm314_vm13, %v940_v25, %v311_v29 }
 0x51e   :  { %v320_v35 = vsel %vm317_vm14, %v319_v33, %v315_v32 }
 0x51f   :  { %v334_v40 = vsub.f32 1.0, %v320_v35  ;;  %v340_v42 = vmul.f32 %v320_v35, %v274_v12 }
 0x575   :  { %v325_v34 = vpop.permute.xlu0 %324 }
 0x576   :  { %v327_v36 = vmul.f32 %v325_v34, %v320_v35 }
 0x578   :  { %329 = vrot.lane.b32.xlu1 %v327_v36, %s977_s16 }
 0x5ea   :  { %v330_v37 = vpop.permute.xlu1 %329 }
 0x5eb   :  { %v332_v38 = vadd.f32 %v330_v37, %v276_v20 }
 0x5ed   :  { %941 = vtanh.f32 %v332_v38 }
 0x5f3   :  { %v942_v39 = vpop.eup %941 }
 0x5f4   :  { %336 = vrot.lane.b32.xlu2 %v942_v39, %s979_s4 }
 0x64e   :  { %v337_v41 = vpop.permute.xlu2 %336 }
 0x64f   :  { %v339_v43 = vmul.f32 %v337_v41, %v334_v40 }
 0x651   :  { %v341_v44 = vadd.f32 %v340_v42, %v339_v43 }
 0x653   :  { %345 = vrot.lane.b32.xlu0 %v341_v44, %s979_s4 }
 0x6c5   :  { %v346_v45 = vpop.permute.xlu0 %345 }
 0x6c6   :  { %857 = vmatmul.msk.f32.vlgmr.msrb.gmra.mxu1 %vm141_vm6, %v346_v45 }
 0x743   :  { %v366_v46 = vpop.f32.mrf.mxu1 }
 0x744   :  { %v389_v47 = vadd.f32 %v366_v46, %v1107_v11  ;;  %v369_v49 = vadd.f32 %v366_v46, %v343_v48  ;;  %v477_v46 = vld [vmem:[#allocation2 + $0x28] sm:$0xff] }
 0x746   :  { %391 = vrot.lane.b32.xlu1 %v389_v47, %s977_s16  ;;  %v858_v50 = vmul.f32 -1.442695, %v369_v49 }
 0x748   :  { %943 = vpow2.f32 %v858_v50 }
 0x74e   :  { %v944_v51 = vpop.eup %943 }
 0x74f   :  { %v373_v52 = vadd.f32 1.0, %v944_v51 }
 0x751   :  { %945 = vrcp.f32 %v373_v52  ;;  %v385_v58 = vand.u32 2147483648, %v373_v52  ;;  %vm379_vm2 = vweird.f32 %v373_v52  ;;  %v383_v59 = vand.u32 2147483647, %v373_v52 }
 0x753   :  { %v386_v61 = vor.u32 1.1754944e-38, %v385_v58  ;;  %vm384_vm4 = vcmp.eq.f32.partialorder %v383_v59, 8.507059e+37 }
 0x757   :  { %v946_v53 = vpop.eup %945 }
 0x758   :  { %v375_v54 = vmul.f32 %v946_v53, %v373_v52  ;;  %vm380_vm15 = vweird.f32 %v946_v53 }
 0x759   :  { %vm381_vm3 = vmor %vm379_vm2, %vm380_vm15 }
 0x75a   :  { %v376_v55 = vsub.f32 1.0, %v375_v54 }
 0x75c   :  { %v377_v56 = vmul.f32 %v946_v53, %v376_v55 }
 0x75e   :  { %v378_v57 = vadd.f32 %v946_v53, %v377_v56 }
 0x760   :  { %v382_v60 = vsel %vm381_vm3, %v946_v53, %v378_v57 }
 0x761   :  { %v387_v63 = vsel %vm384_vm4, %v386_v61, %v382_v60 }
 0x762   :  { %v401_v10 = vsub.f32 1.0, %v387_v63  ;;  %v407_v13 = vmul.f32 %v387_v63, %v341_v44 }
 0x7b8   :  { %v392_v62 = vpop.permute.xlu1 %391 }
 0x7b9   :  { %v394_v1 = vmul.f32 %v392_v62, %v387_v63 }
 0x7bb   :  { %396 = vrot.lane.b32.xlu2 %v394_v1, %s977_s16 }
 0x815   :  { %v397_v4 = vpop.permute.xlu2 %396 }
 0x816   :  { %v399_v5 = vadd.f32 %v397_v4, %v343_v48 }
 0x818   :  { %947 = vtanh.f32 %v399_v5 }
 0x81e   :  { %v948_v7 = vpop.eup %947 }
 0x81f   :  { %403 = vrot.lane.b32.xlu0 %v948_v7, %s979_s4 }
 0x891   :  { %v404_v12 = vpop.permute.xlu0 %403 }
 0x892   :  { %v406_v14 = vmul.f32 %v404_v12, %v401_v10 }
 0x894   :  { %v408_v15 = vadd.f32 %v407_v13, %v406_v14 }
 0x896   :  { %412 = vrot.lane.b32.xlu1 %v408_v15, %s979_s4 }
 0x908   :  { %v413_v3 = vpop.permute.xlu1 %412 }
 0x909   :  { %859 = vmatmul.msk.f32.vlgmr.msrb.gmra.mxu2 %vm141_vm6, %v413_v3 }
 0x98c   :  { %v433_v17 = vpop.f32.mrf.mxu2 }
 0x98d   :  { %v456_v18 = vadd.f32 %v433_v17, %v1107_v11  ;;  %v436_v20 = vadd.f32 %v433_v17, %v410_v19 }
 0x98f   :  { %458 = vrot.lane.b32.xlu2 %v456_v18, %s977_s16  ;;  %v860_v21 = vmul.f32 -1.442695, %v436_v20 }
 0x991   :  { %949 = vpow2.f32 %v860_v21 }
 0x997   :  { %v950_v22 = vpop.eup %949 }
 0x998   :  { %v440_v23 = vadd.f32 1.0, %v950_v22 }
 0x99a   :  { %951 = vrcp.f32 %v440_v23  ;;  %v452_v8 = vand.u32 2147483648, %v440_v23  ;;  %vm446_vm5 = vweird.f32 %v440_v23  ;;  %v450_v29 = vand.u32 2147483647, %v440_v23 }
 0x99c   :  { %v453_v31 = vor.u32 1.1754944e-38, %v452_v8  ;;  %vm451_vm8 = vcmp.eq.f32.partialorder %v450_v29, 8.507059e+37 }
 0x9a0   :  { %v952_v24 = vpop.eup %951 }
 0x9a1   :  { %v442_v25 = vmul.f32 %v952_v24, %v440_v23  ;;  %vm447_vm0 = vweird.f32 %v952_v24 }
 0x9a2   :  { %vm448_vm7 = vmor %vm446_vm5, %vm447_vm0 }
 0x9a3   :  { %v443_v26 = vsub.f32 1.0, %v442_v25 }
 0x9a5   :  { %v444_v27 = vmul.f32 %v952_v24, %v443_v26 }
 0x9a7   :  { %v445_v28 = vadd.f32 %v952_v24, %v444_v27 }
 0x9a9   :  { %v449_v30 = vsel %vm448_vm7, %v952_v24, %v445_v28  ;;  %vm755_vm7 = vcmask 523264  }
 0x9aa   :  { %v454_v33 = vsel %vm451_vm8, %v453_v31, %v449_v30 }
 0x9ab   :  { %v468_v38 = vsub.f32 1.0, %v454_v33  ;;  %v474_v40 = vmul.f32 %v454_v33, %v408_v15 }
 0x9e9   :  { %v459_v32 = vpop.permute.xlu2 %458 }
 0x9ea   :  { %v461_v34 = vmul.f32 %v459_v32, %v454_v33 }
 0x9ec   :  { %463 = vrot.lane.b32.xlu0 %v461_v34, %s977_s16 }
 0xa5e   :  { %v464_v35 = vpop.permute.xlu0 %463 }
 0xa5f   :  { %v466_v36 = vadd.f32 %v464_v35, %v410_v19 }
 0xa61   :  { %953 = vtanh.f32 %v466_v36 }
 0xa67   :  { %v954_v37 = vpop.eup %953 }
 0xa68   :  { %470 = vrot.lane.b32.xlu1 %v954_v37, %s979_s4 }
 0xada   :  { %v471_v39 = vpop.permute.xlu1 %470 }
 0xadb   :  { %v473_v41 = vmul.f32 %v471_v39, %v468_v38  ;;  %v611_v39 = vld [vmem:[#allocation2 + $0x38] sm:$0xff] }
 0xadd   :  { %v475_v42 = vadd.f32 %v474_v40, %v473_v41 }
 0xadf   :  { %479 = vrot.lane.b32.xlu2 %v475_v42, %s979_s4 }
 0xb39   :  { %v480_v43 = vpop.permute.xlu2 %479 }
 0xb3a   :  { %861 = vmatmul.msk.f32.vlgmr.msra.gmra.mxu3 %vm141_vm6, %v480_v43 }
 0xbbd   :  { %v500_v44 = vpop.f32.mrf.mxu3 }
 0xbbe   :  { %v523_v45 = vadd.f32 %v500_v44, %v1107_v11  ;;  %v503_v47 = vadd.f32 %v500_v44, %v477_v46 }
 0xbc0   :  { %525 = vrot.lane.b32.xlu0 %v523_v45, %s977_s16  ;;  %v862_v48 = vmul.f32 -1.442695, %v503_v47 }
 0xbc2   :  { %955 = vpow2.f32 %v862_v48 }
 0xbc8   :  { %v956_v49 = vpop.eup %955 }
 0xbc9   :  { %v507_v50 = vadd.f32 1.0, %v956_v49 }
 0xbcb   :  { %957 = vrcp.f32 %v507_v50  ;;  %v519_v56 = vand.u32 2147483648, %v507_v50  ;;  %vm513_vm10 = vweird.f32 %v507_v50  ;;  %v517_v57 = vand.u32 2147483647, %v507_v50 }
 0xbcd   :  { %v520_v59 = vor.u32 1.1754944e-38, %v519_v56  ;;  %vm518_vm12 = vcmp.eq.f32.partialorder %v517_v57, 8.507059e+37 }
 0xbd1   :  { %v958_v51 = vpop.eup %957 }
 0xbd2   :  { %v509_v52 = vmul.f32 %v958_v51, %v507_v50  ;;  %vm514_vm9 = vweird.f32 %v958_v51 }
 0xbd3   :  { %vm515_vm11 = vmor %vm513_vm10, %vm514_vm9 }
 0xbd4   :  { %v510_v53 = vsub.f32 1.0, %v509_v52 }
 0xbd6   :  { %v511_v54 = vmul.f32 %v958_v51, %v510_v53 }
 0xbd8   :  { %v512_v55 = vadd.f32 %v958_v51, %v511_v54 }
 0xbda   :  { %v516_v58 = vsel %vm515_vm11, %v958_v51, %v512_v55 }
 0xbdb   :  { %v521_v61 = vsel %vm518_vm12, %v520_v59, %v516_v58  ;;  %v908_v58 = vld [vmem:[%s1243_s6 + $0x8] sm:$0xff]  ;;  %v907_v59 = vld [vmem:[%s1243_s6] sm:$0xff] }
 0xbdc   :  { %v535_v5 = vsub.f32 1.0, %v521_v61  ;;  %v541_v9 = vmul.f32 %v521_v61, %v475_v42  ;;  %710 = vmatpush.bf16.msrb.mxu3 %v908_v58 }
 0xbe0   :  { %711 = vmatpush.bf16.msrb.mxu3 %v907_v59 }
 0xc32   :  { %v526_v60 = vpop.permute.xlu0 %525 }
 0xc33   :  { %v528_v62 = vmul.f32 %v526_v60, %v521_v61 }
 0xc35   :  { %530 = vrot.lane.b32.xlu1 %v528_v62, %s977_s16 }
 0xca7   :  { %v531_v63 = vpop.permute.xlu1 %530 }
 0xca8   :  { %v533_v1 = vadd.f32 %v531_v63, %v477_v46 }
 0xcaa   :  { %959 = vtanh.f32 %v533_v1 }
 0xcb0   :  { %v960_v4 = vpop.eup %959 }
 0xcb1   :  { %537 = vrot.lane.b32.xlu2 %v960_v4, %s979_s4 }
 0xd0b   :  { %v538_v7 = vpop.permute.xlu2 %537 }
 0xd0c   :  { %v540_v10 = vmul.f32 %v538_v7, %v535_v5  ;;  %v912_v5 = vld [vmem:[%s1244_s8 + $0x18] sm:$0xff] }
 0xd0d   :  { %763 = vmatpush.bf16.msrb.mxu1 %v912_v5 }
 0xd0e   :  { %v542_v12 = vadd.f32 %v541_v9, %v540_v10  ;;  %v911_v9 = vld [vmem:[%s1244_s8 + $0x10] sm:$0xff]  ;;  %v910_v10 = vld [vmem:[%s1244_s8 + $0x8] sm:$0xff] }
 0xd10   :  { %546 = vrot.lane.b32.xlu0 %v542_v12, %s979_s4 }
 0xd11   :  { %764 = vmatpush.bf16.msrb.mxu1 %v911_v9 }
 0xd15   :  { %765 = vmatpush.bf16.msrb.mxu1 %v910_v10 }
 0xd82   :  { %v547_v13 = vpop.permute.xlu0 %546 }
 0xd83   :  { %863 = vmatmul.msk.f32.vlgmr.msra.gmra.mxu1 %vm141_vm6, %v547_v13  ;;  %v922_v13 = vld [vmem:[%s1242_s7] ss:$0 sm:$0xff] }
 0xe00   :  { %v567_v14 = vpop.f32.mrf.mxu1 }
 0xe01   :  { %v590_v15 = vadd.f32 %v567_v14, %v1107_v11  ;;  %v570_v2 = vadd.f32 %v567_v14, %v544_v0 }
 0xe03   :  { %592 = vrot.lane.b32.xlu1 %v590_v15, %s977_s16  ;;  %v864_v3 = vmul.f32 -1.442695, %v570_v2 }
 0xe05   :  { %961 = vpow2.f32 %v864_v3 }
 0xe0b   :  { %v962_v6 = vpop.eup %961 }
 0xe0c   :  { %v574_v16 = vadd.f32 1.0, %v962_v6  ;;  %v914_v6 = vld [vmem:[%s1247_s10 + $0x8] sm:$0xff] }
 0xe0d   :  { %803 = vmatpush.bf16.msrb.mxu2 %v914_v6 }
 0xe0e   :  { %963 = vrcp.f32 %v574_v16  ;;  %v586_v22 = vand.u32 2147483648, %v574_v16  ;;  %vm580_vm14 = vweird.f32 %v574_v16  ;;  %v584_v23 = vand.u32 2147483647, %v574_v16 }
 0xe10   :  { %v587_v25 = vor.u32 1.1754944e-38, %v586_v22  ;;  %vm585_vm2 = vcmp.eq.f32.partialorder %v584_v23, 8.507059e+37  ;;  %v924_v23 = vld [vmem:[%s1246_s11] ss:$0 sm:$0xff] }
 0xe14   :  { %v964_v17 = vpop.eup %963 }
 0xe15   :  { %v576_v18 = vmul.f32 %v964_v17, %v574_v16  ;;  %vm581_vm13 = vweird.f32 %v964_v17  ;;  %v913_v16 = vld [vmem:[%s1247_s10] sm:$0xff]  ;;  %s980_s10 = smov 32  }
 0xe16   :  { %vm582_vm15 = vmor %vm580_vm14, %vm581_vm13  ;;  %804 = vmatpush.bf16.msrb.mxu2 %v913_v16 }
 0xe17   :  { %v577_v19 = vsub.f32 1.0, %v576_v18 }
 0xe19   :  { %v578_v20 = vmul.f32 %v964_v17, %v577_v19 }
 0xe1b   :  { %v579_v21 = vadd.f32 %v964_v17, %v578_v20 }
 0xe1d   :  { %v583_v24 = vsel %vm582_vm15, %v964_v17, %v579_v21  ;;  %v923_v17 = vld [vmem:[%s1245_s9] ss:$0 sm:$0xff] }
 0xe1e   :  { %v588_v27 = vsel %vm585_vm2, %v587_v25, %v583_v24 }
 0xe1f   :  { %v602_v31 = vsub.f32 1.0, %v588_v27  ;;  %v608_v33 = vmul.f32 %v588_v27, %v542_v12  ;;  %v909_v12 = vld [vmem:[%s1244_s8] sm:$0xff] }
 0xe20   :  { %766 = vmatpush.bf16.msrb.mxu1 %v909_v12 }
 0xe75   :  { %v593_v26 = vpop.permute.xlu1 %592 }
 0xe76   :  { %v595_v28 = vmul.f32 %v593_v26, %v588_v27  ;;  %v810_v27 = vld [vmem:[%s1248_s1] sm:$0xff] }
 0xe78   :  { %597 = vrot.lane.b32.xlu2 %v595_v28, %s977_s16 }
 0xed2   :  { %v598_v8 = vpop.permute.xlu2 %597 }
 0xed3   :  { %v600_v29 = vadd.f32 %v598_v8, %v544_v0 }
 0xed5   :  { %965 = vtanh.f32 %v600_v29 }
 0xedb   :  { %v966_v30 = vpop.eup %965 }
 0xedc   :  { %604 = vrot.lane.b32.xlu0 %v966_v30, %s979_s4 }
 0xf4e   :  { %v605_v32 = vpop.permute.xlu0 %604 }
 0xf4f   :  { %v607_v34 = vmul.f32 %v605_v32, %v602_v31 }
 0xf51   :  { %v609_v35 = vadd.f32 %v608_v33, %v607_v34 }
 0xf53   :  { %613 = vrot.lane.b32.xlu1 %v609_v35, %s979_s4 }
 0xfc5   :  { %v614_v36 = vpop.permute.xlu1 %613 }
 0xfc6   :  { %865 = vmatmul.msk.f32.vlgmr.msra.gmra.mxu2 %vm141_vm6, %v614_v36 }
0x1049   :  { %v634_v37 = vpop.f32.mrf.mxu2 }
0x104a   :  { %v657_v38 = vadd.f32 %v634_v37, %v1107_v11  ;;  %v637_v40 = vadd.f32 %v634_v37, %v611_v39 }
0x104c   :  { %659 = vrot.lane.b32.xlu2 %v657_v38, %s977_s16  ;;  %v866_v41 = vmul.f32 -1.442695, %v637_v40 }
0x104e   :  { %967 = vpow2.f32 %v866_v41 }
0x1054   :  { %v968_v42 = vpop.eup %967 }
0x1055   :  { %v641_v43 = vadd.f32 1.0, %v968_v42 }
0x1057   :  { %969 = vrcp.f32 %v641_v43  ;;  %v653_v49 = vand.u32 2147483648, %v641_v43  ;;  %vm647_vm4 = vweird.f32 %v641_v43  ;;  %v651_v50 = vand.u32 2147483647, %v641_v43 }
0x1059   :  { %v654_v51 = vor.u32 1.1754944e-38, %v653_v49  ;;  %vm652_vm5 = vcmp.eq.f32.partialorder %v651_v50, 8.507059e+37 }
0x105d   :  { %v970_v44 = vpop.eup %969 }
0x105e   :  { %v643_v45 = vmul.f32 %v970_v44, %v641_v43  ;;  %vm648_vm3 = vweird.f32 %v970_v44 }
0x105f   :  { %vm649_vm0 = vmor %vm647_vm4, %vm648_vm3 }
0x1060   :  { %v644_v46 = vsub.f32 1.0, %v643_v45 }
0x1062   :  { %v645_v47 = vmul.f32 %v970_v44, %v644_v46 }
0x1064   :  { %v646_v48 = vadd.f32 %v970_v44, %v645_v47 }
0x1066   :  { %v650_v11 = vsel %vm649_vm0, %v970_v44, %v646_v48 }
0x1067   :  { %v655_v53 = vsel %vm652_vm5, %v654_v51, %v650_v11 }
0x1068   :  { %v669_v60 = vsub.f32 1.0, %v655_v53  ;;  %v675_v62 = vmul.f32 %v655_v53, %v609_v35 }
0x10a6   :  { %v660_v52 = vpop.permute.xlu2 %659 }
0x10a7   :  { %v662_v54 = vmul.f32 %v660_v52, %v655_v53 }
0x10a9   :  { %664 = vrot.lane.b32.xlu0 %v662_v54, %s977_s16 }
0x111b   :  { %v665_v55 = vpop.permute.xlu0 %664 }
0x111c   :  { %v667_v56 = vadd.f32 %v665_v55, %v611_v39 }
0x111e   :  { %971 = vtanh.f32 %v667_v56 }
0x1124   :  { %v972_v57 = vpop.eup %971 }
0x1125   :  { %671 = vrot.lane.b32.xlu1 %v972_v57, %s979_s4 }
0x1197   :  { %v672_v61 = vpop.permute.xlu1 %671 }
0x1198   :  { %v674_v63 = vmul.f32 %v672_v61, %v669_v60 }
0x119a   :  { %v676_v1 = vadd.f32 %v675_v62, %v674_v63 }
0x119c   :  { %v677_v4 = vpack.c.bf16 %v676_v1, %v676_v1 }
0x119e   :  { %687 = vrot.lane.b32.xlu2 %v677_v4, %s979_s4 }
0x11f8   :  { %v688_v7 = vpop.permute.xlu2 %687 }
0x11f9   :  { %875 = vmatmul.msk.bf16.vlgmr.msrb.gmra.mxu3 %vm141_vm6, %v688_v7 }
0x127c   :  { %v713_v14 = vpop.f32.mrf.mxu3 }
0x127d   :  { %v714_v15 = vadd.f32 %v922_v13, %v713_v14 }
0x127f   :  { %973 = vtanh.f32 %v714_v15 }
0x1284   :  { %v715_v0 = vpop.f32.mrf.mxu3 }
0x1285   :  { %v974_v2 = vpop.eup %973 }
0x1286   :  { %v718_v3 = vpack.c.bf16 %v974_v2, %v974_v2 }
0x1288   :  { %892 = vmatmul.msk.bf16.vlgmr.msrb.gmra.mxu1 %vm755_vm7, %v718_v3 }
0x1305   :  { %v768_v18 = vpop.f32.mrf.mxu1 }
0x1306   :  { %v769_v19 = vadd.f32 %v923_v17, %v768_v18 }
0x1308   :  { %975 = vtanh.f32 %v769_v19 }
0x130d   :  { %v770_v20 = vpop.f32.mrf.mxu1 }
0x130e   :  { %v976_v21 = vpop.eup %975 }
0x130f   :  { %v773_v22 = vpack.c.bf16 %v976_v21, %v976_v21 }
0x1311   :  { %901 = vmatmul.msk.bf16.vlgmr.msrb.gmra.mxu2 %vm141_vm6, %v773_v22 }
0x1394   :  { %v806_v24 = vpop.f32.mrf.mxu2 }
0x1395   :  { %v807_v25 = vadd.f32 %v924_v23, %v806_v24 }
0x1397   :  { %817 = vrot.lane.b32.xlu1 %v807_v25, %s980_s10  ;;  %813 = vrot.lane.b32.xlu0 %v807_v25, %s979_s4  ;;  %v811_v28 = vmul.f32 %v810_v27, %v807_v25 }
0x139c   :  { %v808_v26 = vpop.f32.mrf.mxu2 }
0x1409   :  { %v814_v8 = vpop.permute.xlu0 %813  ;;  %v818_v30 = vpop.permute.xlu1 %817 }
0x140a   :  { %v816_v29 = vadd.f32 %v814_v8, %v811_v28 }
0x140c   :  { %v820_v31 = vsel %vm141_vm6, %v816_v29, %v818_v30 }
0x140d   :  { %v821_v32 = vsel %vm755_vm7, %v820_v31, %v818_v30 }
0x140e   :  { %v822_v33 = vsel %vm124_vm1, %v821_v32, 0.0 }
0x140f   :  { %823 = vst [vmem:[%s1249_s12] sm:$0xff] %v822_v33 }

</bundles_post_ra>
